<compile_context>
chip_gen: v5e
topology: v5e:2x2
jax: 0.10.0
libtpu: 0.0.40
codegen_flags: <defaults>
</compile_context>

<pallas_src>
import jax
import jax.numpy as jnp
from jax.experimental import pallas as pl
from jax.experimental.pallas import tpu as pltpu


# ----------------------------------------------------------------------------
# Pallas kernel: out[b] = W' @ x[b]   with W' = edge_weights + I  (residual folded)
#   w_ref : (C, C)      VMEM-resident across grid steps
#   x_ref : (1, C, F)   one batch tile
#   o_ref : (1, C, F)
# ----------------------------------------------------------------------------
def _spatial_graph_kernel(w_ref, x_ref, o_ref):
    o_ref[0] = jnp.dot(
        w_ref[...], x_ref[0], preferred_element_type=jnp.float32
    ).astype(o_ref.dtype)


def spatial_graph_forward(edge_weights: jax.Array, x: jax.Array) -> jax.Array:
    """x: [B, C, F], edge_weights: [C, C] -> [B, C, F]  (x + A @ x per batch)."""
    B, C, F = x.shape

    # Fold the residual into the weight matrix: (A + I) @ x == x + A @ x.
    w_res = (edge_weights + jnp.eye(C, dtype=edge_weights.dtype)).astype(x.dtype)

    itemsize = jnp.dtype(x.dtype).itemsize
    cost = pl.CostEstimate(
        flops=2 * B * C * C * F,
        bytes_accessed=itemsize * (C * C + 2 * B * C * F),
        transcendentals=0,
    )

    return pl.pallas_call(
        _spatial_graph_kernel,
        out_shape=jax.ShapeDtypeStruct((B, C, F), x.dtype),
        grid_spec=pltpu.PrefetchScalarGridSpec(
            num_scalar_prefetch=0,
            grid=(B,),
            in_specs=[
                # W' kept VMEM-resident: same block index every step.
                pl.BlockSpec((C, C), lambda b: (0, 0)),
                # One batch row per grid step, straight from the [B, C, F] buffer.
                pl.BlockSpec((1, C, F), lambda b: (b, 0, 0)),
            ],
            out_specs=pl.BlockSpec((1, C, F), lambda b: (b, 0, 0)),
        ),
        compiler_params=pltpu.CompilerParams(dimension_semantics=("parallel",)),
        cost_estimate=cost,
    )(w_res, x)


# ----------------------------------------------------------------------------
# Deterministic parameter init (mirrors module __init__ shapes)
# ----------------------------------------------------------------------------
def _xavier_uniform(key, shape, fan_in, fan_out):
    limit = jnp.sqrt(6.0 / (fan_in + fan_out))
    return jax.random.uniform(key, shape, minval=-limit, maxval=limit,
                              dtype=jnp.float32)


def init_params(key):
    k = jax.random.split(key, 4)
    # relative_pos_embedding: (3, 3, 16)
    rel_pos_emb = _xavier_uniform(k[0], (3, 3, 16), fan_in=3 * 16, fan_out=3 * 16)
    # overlap_embedding: (16,)  (xavier on a 1-D tensor is ill-defined; small uniform)
    overlap_emb = jax.random.uniform(k[1], (16,), minval=-0.5, maxval=0.5,
                                     dtype=jnp.float32)
    # pos_proj: Linear(16, 32) -> ReLU -> Linear(32, 1)
    w1 = _xavier_uniform(k[2], (16, 32), fan_in=16, fan_out=32)
    b1 = jnp.zeros((32,), jnp.float32)
    w2 = _xavier_uniform(k[3], (32, 1), fan_in=32, fan_out=1)
    b2 = jnp.zeros((1,), jnp.float32)
    return dict(rel_pos_emb=rel_pos_emb, overlap_emb=overlap_emb,
                w1=w1, b1=b1, w2=w2, b2=b2)


# ----------------------------------------------------------------------------
# Graph construction glue (plain JAX, run once) -- replicates build_graph
# semantics for the default all-zero spatial statistics.
# ----------------------------------------------------------------------------
def build_edge_weights(params, num_classes, positions, sizes, overlaps,
                       scale_weights, positional_adjustment):
    # With zero `sizes`, every per-class spatial distribution is uniform, so
    # EMD(dist_i, dist_j) == 0 exactly and similarity == 1 at every scale.
    # TODO(synk): general EMD uses scipy.optimize.linear_sum_assignment
    # (Hungarian algorithm); no Pallas/JAX equivalent, but it is exactly 0 here.
    emd_sum = float(sum(w * 1.0 for w in scale_weights))  # == 1.0

    pi = positions[:, None, :]   # (C, 1, 2)
    pj = positions[None, :, :]   # (1, C, 2)
    rel_x = jnp.where(pi[..., 0] < pj[..., 0], 1,
                      jnp.where(pi[..., 0] > pj[..., 0], 2, 0))
    rel_y = jnp.where(pi[..., 1] < pj[..., 1], 1,
                      jnp.where(pi[..., 1] > pj[..., 1], 2, 0))
    pos_emb = params["rel_pos_emb"][rel_y, rel_x]                    # (C, C, 16)
    overlap_emb = params["overlap_emb"][None, None, :] * overlaps[..., None]
    combined = pos_emb + overlap_emb                                  # (C, C, 16)

    h = jnp.maximum(combined @ params["w1"] + params["b1"], 0.0)      # (C, C, 32)
    adj = jax.nn.sigmoid(h @ params["w2"] + params["b2"])[..., 0]     # (C, C)

    ew = emd_sum * (1.0 + positional_adjustment * adj)
    ew = ew * (1.0 - jnp.eye(num_classes, dtype=ew.dtype))            # i != j only
    mx = jnp.max(ew)
    ew = jnp.where(mx > 0, ew / mx, ew)
    return ew


# ----------------------------------------------------------------------------
# Main
# ----------------------------------------------------------------------------
if __name__ == "__main__":
    num_classes = 8
    feature_dim = 32
    batch = 2
    scales = [5, 15, 25]
    scale_weights = [0.2, 0.3, 0.5]
    positional_adjustment = 0.2

    key = jax.random.PRNGKey(0)
    k_param, k_x = jax.random.split(key)

    params = init_params(k_param)

    # Default registered buffers (no spatial_statistics supplied).
    positions = jnp.zeros((num_classes, 2), jnp.float32)
    sizes = jnp.zeros((num_classes, 2), jnp.float32)
    overlaps = jnp.zeros((num_classes, num_classes), jnp.float32)

    edge_weights = build_edge_weights(
        params, num_classes, positions, sizes, overlaps,
        scale_weights, positional_adjustment)

    x = jax.random.normal(k_x, (batch, num_classes, feature_dim), jnp.float32)

    out = spatial_graph_forward(edge_weights, x)
    out = jax.block_until_ready(out)

    # Reference check (plain JAX bmm + residual).  Note: the kernel accumulates
    # the residual inside the MXU's f32 accumulator (W+I fold), so last-ulp
    # differences vs the separate-add formulation are possible.
    ref = x + jnp.einsum("ij,bjf->bif", edge_weights, x)
    assert out.shape == x.shape
    assert jnp.allclose(out, ref, atol=1e-5, rtol=1e-5), "mismatch vs reference"

    print("KERNEL_OK")
</pallas_src>

<mosaic_0001>
module attributes {stable_mosaic.version = 11 : i64} {
  func.func @_spatial_graph_kernel(%arg0: i32, %arg1: memref<8x8xf32, #tpu.memory_space<vmem>>, %arg2: memref<1x8x32xf32, #tpu.memory_space<vmem>>, %arg3: memref<1x8x32xf32, #tpu.memory_space<vmem>>) attributes {dimension_semantics = [#tpu.dimension_semantics<parallel>], iteration_bounds = array<i64: 2>, scalar_prefetch = 0 : i64, scratch_operands = 0 : i64, tpu.core_type = #tpu.core_type<tc>, window_params = [{pipeline_mode = #tpu.pipeline_mode<synchronous>, transform_indices = @transform_0, window_bounds = array<i64: 8, 8>}, {transform_indices = @transform_1, window_bounds = array<i64: 1, 8, 32>}, {transform_indices = @transform_2, window_bounds = array<i64: 1, 8, 32>}]} {
    %c0 = arith.constant 0 : index
    %c0_0 = arith.constant 0 : index
    %0 = vector.load %arg1[%c0, %c0_0] : memref<8x8xf32, #tpu.memory_space<vmem>>, vector<8x8xf32>
    %c0_1 = arith.constant 0 : index
    %c0_2 = arith.constant 0 : index
    %c0_3 = arith.constant 0 : index
    %1 = vector.load %arg2[%c0_1, %c0_2, %c0_3] : memref<1x8x32xf32, #tpu.memory_space<vmem>>, vector<1x8x32xf32>
    %2 = vector.shape_cast %1 : vector<1x8x32xf32> to vector<8x32xf32>
    %cst = arith.constant dense<0.000000e+00> : vector<8x32xf32>
    %3 = tpu.matmul %0, %2, %cst {dimension_numbers = #tpu.dot_dimension_numbers<[1], [0], [0], [1], [0, 0, 1, 1], [], []>} : vector<8x8xf32>, vector<8x32xf32>, vector<8x32xf32> -> vector<8x32xf32>
    %c0_4 = arith.constant 0 : index
    %c0_5 = arith.constant 0 : index
    %c0_6 = arith.constant 0 : index
    %4 = vector.load %arg3[%c0_4, %c0_5, %c0_6] : memref<1x8x32xf32, #tpu.memory_space<vmem>>, vector<1x8x32xf32>
    %5 = vector.shape_cast %4 : vector<1x8x32xf32> to vector<8x32xf32>
    %6 = vector.shape_cast %3 : vector<8x32xf32> to vector<1x8x32xf32>
    tpu.vector_store %arg3[%c0_4, %c0_5, %c0_6], %6 {strides = array<i32>} : memref<1x8x32xf32, #tpu.memory_space<vmem>>, vector<1x8x32xf32>,
    return
  }
  func.func @transform_0(%arg0: i32) -> (i32, i32) {
    %c0_i32 = arith.constant 0 : i32
    %c0_i32_0 = arith.constant 0 : i32
    %c0_i32_1 = arith.constant 0 : i32
    return %c0_i32, %c0_i32_0 : i32, i32
  }
  func.func @transform_1(%arg0: i32) -> (i32, i32, i32) {
    %c0_i32 = arith.constant 0 : i32
    %c0_i32_0 = arith.constant 0 : i32
    %c0_i32_1 = arith.constant 0 : i32
    return %arg0, %c0_i32, %c0_i32_0 : i32, i32, i32
  }
  func.func @transform_2(%arg0: i32) -> (i32, i32, i32) {
    %c0_i32 = arith.constant 0 : i32
    %c0_i32_0 = arith.constant 0 : i32
    %c0_i32_1 = arith.constant 0 : i32
    return %arg0, %c0_i32, %c0_i32_0 : i32, i32, i32
  }
}

</mosaic_0001>

<bundles_post_ra>
// kernel: tpu_custom_call.1
= control target key start
LH: loop header
LB: loop body
LE: loop exit
PB: predicated region body
PF: predicated region fallthrough
CT: control target
= control target key end

     0   :  { %7 = vsyncpa [#allocation3], 0  ;;  %s660_s0 = inlined_call_operand.hbm [shape: f32[8,8], index: 0, kind: input, shape index: {}]   ;;  %s661_s1 = inlined_call_operand.hbm [shape: f32[2,8,32], index: 1, kind: input, shape index: {}]   ;;  %s662_s2 = inlined_call_operand.hbm [shape: f32[2,8,32], index: 2, kind: output, shape index: {}]  }
   0x1   :  { %8 = vsyncpa [#allocation6], 0 }
   0x2   :  { %10 = vsyncpa [#allocation6 + $0x1], 0 }
   0x3   :  { %11 = vsyncpa [#allocation4], 0 }
   0x4   :  { %13 = vsyncpa [#allocation4 + $0x1], 0  ;;  %s522_s9 = smov 0   ;;  %s524_s10 = smov 0  }
   0x5   :  { %s526_s11 = smov 0   ;;  %s528_s12 = smov 0  }
   0x6 LB: > { %s543_s13 = sadd.s32 4294967295, %s504_s12   ;;  %s302_s14 = sadd.s32 4294967294, %s504_s12   ;;  %s504_s12 = sphi %s528_s12, %s672_s12   ;;  %s500_s11 = sphi %s526_s11, %s671_s11   ;;  %s496_s10 = sphi %s524_s10, %s670_s10   ;;  %s492_s9 = sphi %s522_s9, %s669_s9  }
   0x7   : > { %p60_p0 = scmp.ne.s32.totalorder %s496_s10, %s492_s9  ;;  %p61_p1 = scmp.eq.s32.totalorder %s543_s13, 0 }
   0x8   : > { %p84_p2 = scmp.eq.s32.totalorder %s543_s13, 1  ;;  %p90_p3 = scmp.eq.s32.totalorder %s302_s14, 1 }
   0x9   : > { %p552_p4 = por %p61_p1, %p60_p0  ;;  %p303_p5 = scmp.ge.s32.totalorder %s504_s12, 1 }
   0xa   : > { %p557_p6 = por %p90_p3, %p60_p0  ;;  %p97_p7 = scmp.lt.s32.totalorder %s504_s12, 3 }
   0xb   : > { %s109_s19 = sshll.u32 %s660_s0, 4  ;;  %s506_s21 = smov [#allocation2]   ;;  %s110_s19 = int_to_ptr.hbm [resolvable:$true] %s109_s19 }
   0xc   : > { %p565_p8 = pnand %p303_p5, %p97_p7  ;;  %s111_s22 = sshll.u32 %s506_s21, 4  ;;  %s112_s22 = int_to_ptr.vmem [resolvable:$true] %s111_s22 }
   0xd   : > { %s575_s23 = sadd.s32 1, %s504_s12   ;;  %s47_s24 = sadd.s32 1, %s500_s11 }
   0xe   : > { %p325_p10 = pneg %p565_p8  ;;  %s44_s25 = ssub.s32 %s504_s12, %s575_s23 }
   0xf   : > { %p45_p12 = scmp.eq.s32.totalorder %s44_s25, 0  ;;  %p54_p13 = scmp.ne.s32.totalorder %s500_s11, %s496_s10 }
  0x10   : > { %p326_p11 = pnand %p325_p10, %p61_p1  ;;  %p55_p0 = scmp.eq.s32.totalorder %s504_s12, 0 }
  0x11   : > { %s584_s26 = scalar_select %p45_p12, %s500_s11, %s47_s24  }
  0x12   : > { %328 = dma.hbm_to_vmem [thread:$0]  (!%p326_p11), %s110_s19, 128, %s112_s22, [#allocation3]  }
  0x13   : > { %p588_p3 = por %p84_p2, %p54_p13  ;;  %p338_p5 = scmp.lt.s32.totalorder %s504_s12, 2 }
  0x14   : > { %s122_s28 = sand.u32 1, %s500_s11   ;;  %s307_s29 = sshll.u32 %s504_s12, 3 }
  0x15   : > { %p56_p7 = por %p55_p0, %p54_p13  ;;  %s306_s30 = sshll.u32 %s122_s28, 3 }
  0x16   : > { %s130_s5 = scalar_lea.hbm %s661_s1, %s307_s29  ;;  %s126_s7 = scalar_lea.vmem [#allocation5], %s306_s30 }
  0x17   : > { %s132_s6 = sshll.u32 %s130_s5, 4  ;;  %s134_s8 = sshll.u32 %s126_s7, 4  ;;  %s133_s6 = int_to_ptr.hbm [resolvable:$true] %s132_s6  ;;  %s135_s8 = int_to_ptr.vmem [resolvable:$true] %s134_s8 }
  0x18   : > { %p598_p10 = pnand %p338_p5, %p56_p7  ;;  %s123_s17 = scalar_lea.sflag [#allocation6], %s122_s28 }
  0x19   : > { %s404_s18 = sshra.s32 %s133_s6, 4  ;;  %s411_s24 = scalar_lea.hbm %s661_s1, 16  ;;  %s405_s18 = int_to_ptr.hbm [resolvable:$true] %s404_s18 }
  0x1a   : > { %s406_s19 = scalar_lea.hbm %s405_s18, 8  ;;  %p408_p11 = pneg %p598_p10 }
  0x1b   : > { %p407_p2 = scmp.ne.s32.totalorder %s405_s18, %s406_s19  ;;  %p412_p0 = scmp.lt.s32.totalorder %s405_s18, %s661_s1 }
  0x1c   : > { %p413_p5 = scmp.lt.s32.totalorder %s411_s24, %s406_s19 }
  0x1d   : > { %p409_p12 = pnand %p408_p11, %p407_p2 }
  0x1e   : > { %p414_p7 = por %p413_p5, %p412_p0 }
  0x1f   : > { %p410_p13 = pneg %p409_p12 }
  0x21   : > { %p415_p9 = pnand %p414_p7, %p410_p13 }
  0x23   : > { %418 = shalt.err (!%p415_p9)
}
  0x24   : > { %332 = dma.hbm_to_vmem [thread:$0]  (!%p598_p10), %s133_s6, 128, %s135_s8, %s123_s17  }
  0x25   : > { %143 = sbr.rel (%p565_p8) target bundleno = 178 (0xb2), region = 28 }
  0x2a   : > { %479 = dma.done.wait (%p61_p1), [#allocation3], 128  }
  0x2b   : > { %481 = vsyncadd (%p61_p1), [#allocation3], 4294967168  ;;  %s619_s28 = sand.u32 1, %s496_s10  }
  0x2c   : > { %s310_s30 = sshll.u32 %s619_s28, 3  ;;  %s151_s3 = scalar_lea.sflag [#allocation6], %s619_s28 }
  0x2d   : > { %s154_s4 = scalar_lea.vmem [#allocation5], %s310_s30 }
  0x2e   : > { %483 = dma.done.wait (%p552_p4), %s151_s3, 128  }
  0x2f   : > { %485 = vsyncadd (%p552_p4), %s151_s3, 4294967168  ;;  %vm178_vm0 = vcmask 64512   ;;  %v177_v0 = vld [vmem:[%s154_s4] sm:$0xff]  ;;  %v176_v1 = vld [vmem:[#allocation2] sm:$0xff]  ;;  %s314_s20 = sshll.u32 %s543_s13, 3  ;;  %s175_s8 = scalar_lea.vmem [#allocation7], %s310_s30 }
  0x30   : > { %197 = vmatpush.msra.mxu0 %v177_v0  ;;  %s215_s7 = scalar_lea.hbm %s662_s2, %s314_s20  ;;  %s217_s14 = sshll.u32 %s175_s8, 4  ;;  %vm202_vm1 = vcmask 261120   ;;  %s218_s14 = int_to_ptr.vmem [resolvable:$true] %s217_s14 }
  0x31   : > { %312 = vmatmul.msk.f32.vlgmr.msra.gmra.mxu0 %vm178_vm0, %v176_v1  ;;  %s219_s17 = sshll.u32 %s215_s7, 4  ;;  %s205_s15 = scalar_lea.sflag [#allocation4], %s619_s28  ;;  %s220_s17 = int_to_ptr.hbm [resolvable:$true] %s219_s17 }
  0x32   : > { %s448_s18 = sshra.s32 %s220_s17, 4  ;;  %s454_s22 = scalar_lea.hbm %s662_s2, 16  ;;  %s449_s18 = int_to_ptr.hbm [resolvable:$true] %s448_s18 }
  0x33   : > { %s450_s19 = scalar_lea.hbm %s449_s18, 8  ;;  %p455_p9 = scmp.lt.s32.totalorder %s449_s18, %s662_s2 }
  0x34   : > { %p451_p1 = scmp.ne.s32.totalorder %s449_s18, %s450_s19  ;;  %p456_p10 = scmp.lt.s32.totalorder %s454_s22, %s450_s19 }
  0x36   : > { %p452_p4 = pnand %p451_p1, %p588_p3  ;;  %p457_p2 = por %p456_p10, %p455_p9 }
  0x38   : > { %p453_p8 = pneg %p452_p4 }
  0x3a   : > { %p458_p11 = pnand %p457_p2, %p453_p8 }
  0xae   : > { %v199_v2 = vpop.f32.mrf.mxu0 }
  0xaf   : > { %203 = vst.msk [vmem:[%s175_s8] sm:$0xff] %vm202_vm1, %v199_v2 }
  0xb0   : > { %461 = shalt.err (!%p458_p11)
}
  0xb1   : > { %323 = dma.vmem_to_hbm [thread:$0]  (%p588_p3), %s218_s14, 128, %s220_s17, %s205_s15  }
  0xb2 PF: > { %s231_s29 = sand.u32 1, %s492_s9   ;;  %p668_p12 = scmp.ge.s32.totalorder %s504_s12, 2 }
  0xb3   : > { %s232_s28 = scalar_lea.sflag [#allocation4], %s231_s29 }
  0xb4   : > { %p334_p13 = pnand %p668_p12, %p557_p6 }
  0xb6   : > { %p335_p0 = pneg %p334_p13 }
  0xb8   : > { %487 = dma.done.wait (%p335_p0), %s232_s28, 128  }
  0xb9   : > { %489 = vsyncadd (%p335_p0), %s232_s28, 4294967168  ;;  %p16_p5 = scmp.ge.s32.totalorder %s575_s23, 4   ;;  %s669_s9 = smov %s496_s10 }
  0xba   : > { %s670_s10 = smov %s500_s11  ;;  %s671_s11 = smov %s584_s26 }
  0xbb   : > { %s672_s12 = smov %s575_s23  ;;  %18 = sbr.rel (!%p16_p5) target bundleno = 6 (0x6), region = 78 }
  0xc0   :  { %238 = vsyncpa [#allocation3], 1 }
  0xc1   :  { %240 = vsyncpa [#allocation3 + $0x1], 1 }
  0xc2   :  { %241 = vsyncpa [#allocation6], 1 }
  0xc3   :  { %243 = vsyncpa [#allocation6 + $0x1], 1 }
  0xc4   :  { %244 = vsyncpa [#allocation4], 1 }
  0xc5   :  { %246 = vsyncpa [#allocation4 + $0x1], 1 }

</bundles_post_ra>
